<compile_context>
chip_gen: v7x
topology: tpu7x:2x2x1
jax: 0.10.0
libtpu: 0.0.40
codegen_flags: <defaults>
</compile_context>

<pallas_src>
import jax
import jax.numpy as jnp
from jax import lax
from jax.experimental import pallas as pl
from jax.experimental.pallas import tpu as pltpu


def _round_up(x: int, m: int) -> int:
    return ((x + m - 1) // m) * m


def _mlp_kernel(x_ref, w_ref, out_ref, cat_ref, acc_ref):
    # x_ref:   (tm, tk)      VMEM   activation tile
    # w_ref:   (tn, tk)      VMEM   nn.Linear weight tile (out_dim-major)
    # out_ref: (tm, tn)      VMEM   x @ W^T tile
    # cat_ref: (2, tm, tn)   VMEM   both halves of torch.cat([x, x], 0)
    # acc_ref: (tm, tn) f32  VMEM   accumulator scratch
    k = pl.program_id(2)

    @pl.when(k == 0)
    def _():
        acc_ref[...] = jnp.zeros_like(acc_ref)

    # Contract over D without an in-kernel .T (MXU-native, no XLU shuffle).
    acc_ref[...] += lax.dot_general(
        x_ref[...],
        w_ref[...],
        dimension_numbers=(((1,), (1,)), ((), ())),
        preferred_element_type=jnp.float32,
    )

    @pl.when(k == pl.num_programs(2) - 1)
    def _():
        o = acc_ref[...].astype(out_ref.dtype)
        out_ref[...] = o
        cat_ref[0, :, :] = o
        cat_ref[1, :, :] = o


def multi_output_arg_mlp(x, w, *, tm=128, tn=128, tk=512):
    """x: (B, dim), w: (out_dim, dim) [nn.Linear layout].

    Returns (x @ w.T, concat([x @ w.T, x @ w.T], axis=0)).
    """
    B, D = x.shape
    N, D2 = w.shape
    assert D == D2

    # Clamp tiles to the (padded) problem size; keep sublane/lane alignment.
    tm = min(tm, _round_up(B, 8))
    tn = min(tn, _round_up(N, 128))
    tk = min(tk, _round_up(D, 128))
    Mp = _round_up(B, tm)
    Np = _round_up(N, tn)
    Kp = _round_up(D, tk)

    xp = x if (Mp == B and Kp == D) else jnp.pad(x, ((0, Mp - B), (0, Kp - D)))
    wp = w if (Np == N and Kp == D) else jnp.pad(w, ((0, Np - N), (0, Kp - D)))

    grid = (Mp // tm, Np // tn, Kp // tk)

    out_p, cat_p = pl.pallas_call(
        _mlp_kernel,
        out_shape=(
            jax.ShapeDtypeStruct((Mp, Np), x.dtype),
            jax.ShapeDtypeStruct((2, Mp, Np), x.dtype),
        ),
        grid=grid,
        in_specs=[
            pl.BlockSpec((tm, tk), lambda i, j, k: (i, k)),
            pl.BlockSpec((tn, tk), lambda i, j, k: (j, k)),
        ],
        out_specs=(
            pl.BlockSpec((tm, tn), lambda i, j, k: (i, j)),
            pl.BlockSpec((2, tm, tn), lambda i, j, k: (0, i, j)),
        ),
        scratch_shapes=[pltpu.VMEM((tm, tn), jnp.float32)],
        compiler_params=pltpu.CompilerParams(
            dimension_semantics=("parallel", "parallel", "arbitrary"),
        ),
    )(xp, wp)

    out = out_p[:B, :N]
    # (2, B, N) -> (2B, N) is exactly torch.cat([x, x], dim=0) in row-major.
    cat = cat_p[:, :B, :N].reshape(2 * B, N)
    return out, cat


if __name__ == "__main__":
    # Small shapes consistent with the module: dim=32, out_dim=16, batch=8.
    batch, dim, out_dim = 8, 32, 16

    key = jax.random.PRNGKey(0)
    kx, kw = jax.random.split(key)
    x = jax.random.normal(kx, (batch, dim), dtype=jnp.float32)
    # Deterministic "kaiming-uniform-ish" init for nn.Linear(dim, out_dim, bias=False).
    bound = 1.0 / (dim ** 0.5)
    w = jax.random.uniform(kw, (out_dim, dim), dtype=jnp.float32,
                           minval=-bound, maxval=bound)

    out, cat = multi_output_arg_mlp(x, w)
    jax.block_until_ready((out, cat))

    # Correctness check against plain JAX reference.
    ref_out = x @ w.T
    ref_cat = jnp.concatenate([ref_out, ref_out], axis=0)
    assert out.shape == (batch, out_dim)
    assert cat.shape == (2 * batch, out_dim)
    assert jnp.allclose(out, ref_out, atol=1e-5, rtol=1e-5)
    assert jnp.allclose(cat, ref_cat, atol=1e-5, rtol=1e-5)

    print("KERNEL_OK")
</pallas_src>

<mosaic_0001>
module attributes {stable_mosaic.version = 11 : i64} {
  func.func @_mlp_kernel(%arg0: i32, %arg1: i32, %arg2: i32, %arg3: memref<8x128xf32, #tpu.memory_space<vmem>>, %arg4: memref<128x128xf32, #tpu.memory_space<vmem>>, %arg5: memref<8x128xf32, #tpu.memory_space<vmem>>, %arg6: memref<2x8x128xf32, #tpu.memory_space<vmem>>, %arg7: memref<8x128xf32, #tpu.memory_space<vmem>>) attributes {dimension_semantics = [#tpu.dimension_semantics<parallel>, #tpu.dimension_semantics<parallel>, #tpu.dimension_semantics<arbitrary>], iteration_bounds = array<i64: 1, 1, 1>, scalar_prefetch = 0 : i64, scratch_operands = 1 : i64, tpu.core_type = #tpu.core_type<tc>, window_params = [{transform_indices = @transform_0, window_bounds = array<i64: 8, 128>}, {transform_indices = @transform_1, window_bounds = array<i64: 128, 128>}, {transform_indices = @transform_2, window_bounds = array<i64: 8, 128>}, {transform_indices = @transform_3, window_bounds = array<i64: 2, 8, 128>}]} {
    %c0_i32 = arith.constant 0 : i32
    %0 = arith.cmpi eq, %arg2, %c0_i32 : i32
    %1 = arith.extui %0 : i1 to i32
    %c0_i32_0 = arith.constant 0 : i32
    %2 = arith.cmpi ne, %1, %c0_i32_0 : i32
    scf.if %2 {
      %cst_10 = arith.constant 0.000000e+00 : f32
      %12 = vector.broadcast %cst_10 : f32 to vector<8x128xf32>
      %c0_11 = arith.constant 0 : index
      %c0_12 = arith.constant 0 : index
      %13 = vector.load %arg7[%c0_11, %c0_12] : memref<8x128xf32, #tpu.memory_space<vmem>>, vector<8x128xf32>
      tpu.vector_store %arg7[%c0_11, %c0_12], %12 {strides = array<i32>} : memref<8x128xf32, #tpu.memory_space<vmem>>, vector<8x128xf32>,
    } else {
    }
    %c0 = arith.constant 0 : index
    %c0_1 = arith.constant 0 : index
    %3 = vector.load %arg7[%c0, %c0_1] : memref<8x128xf32, #tpu.memory_space<vmem>>, vector<8x128xf32>
    %c0_2 = arith.constant 0 : index
    %c0_3 = arith.constant 0 : index
    %4 = vector.load %arg3[%c0_2, %c0_3] : memref<8x128xf32, #tpu.memory_space<vmem>>, vector<8x128xf32>
    %c0_4 = arith.constant 0 : index
    %c0_5 = arith.constant 0 : index
    %5 = vector.load %arg4[%c0_4, %c0_5] : memref<128x128xf32, #tpu.memory_space<vmem>>, vector<128x128xf32>
    %cst = arith.constant dense<0.000000e+00> : vector<8x128xf32>
    %6 = tpu.matmul %4, %5, %cst {dimension_numbers = #tpu.dot_dimension_numbers<[1], [1], [0], [0], [0, 0, 1, 0], [], []>} : vector<8x128xf32>, vector<128x128xf32>, vector<8x128xf32> -> vector<8x128xf32>
    %7 = arith.addf %3, %6 : vector<8x128xf32>
    %c0_6 = arith.constant 0 : index
    %c0_7 = arith.constant 0 : index
    %8 = vector.load %arg7[%c0_6, %c0_7] : memref<8x128xf32, #tpu.memory_space<vmem>>, vector<8x128xf32>
    tpu.vector_store %arg7[%c0_6, %c0_7], %7 {strides = array<i32>} : memref<8x128xf32, #tpu.memory_space<vmem>>, vector<8x128xf32>,
    %c0_i32_8 = arith.constant 0 : i32
    %9 = arith.cmpi eq, %arg2, %c0_i32_8 : i32
    %10 = arith.extui %9 : i1 to i32
    %c0_i32_9 = arith.constant 0 : i32
    %11 = arith.cmpi ne, %10, %c0_i32_9 : i32
    scf.if %11 {
      %c0_10 = arith.constant 0 : index
      %c0_11 = arith.constant 0 : index
      %12 = vector.load %arg7[%c0_10, %c0_11] : memref<8x128xf32, #tpu.memory_space<vmem>>, vector<8x128xf32>
      %c0_12 = arith.constant 0 : index
      %c0_13 = arith.constant 0 : index
      %13 = vector.load %arg5[%c0_12, %c0_13] : memref<8x128xf32, #tpu.memory_space<vmem>>, vector<8x128xf32>
      tpu.vector_store %arg5[%c0_12, %c0_13], %12 {strides = array<i32>} : memref<8x128xf32, #tpu.memory_space<vmem>>, vector<8x128xf32>,
      %c0_14 = arith.constant 0 : index
      %c0_15 = arith.constant 0 : index
      %c0_16 = arith.constant 0 : index
      %14 = vector.load %arg6[%c0_14, %c0_15, %c0_16] : memref<2x8x128xf32, #tpu.memory_space<vmem>>, vector<1x8x128xf32>
      %15 = vector.shape_cast %14 : vector<1x8x128xf32> to vector<8x128xf32>
      %16 = vector.shape_cast %12 : vector<8x128xf32> to vector<1x8x128xf32>
      tpu.vector_store %arg6[%c0_14, %c0_15, %c0_16], %16 {strides = array<i32>} : memref<2x8x128xf32, #tpu.memory_space<vmem>>, vector<1x8x128xf32>,
      %c1 = arith.constant 1 : index
      %c0_17 = arith.constant 0 : index
      %c0_18 = arith.constant 0 : index
      %17 = vector.load %arg6[%c1, %c0_17, %c0_18] : memref<2x8x128xf32, #tpu.memory_space<vmem>>, vector<1x8x128xf32>
      %18 = vector.shape_cast %17 : vector<1x8x128xf32> to vector<8x128xf32>
      %19 = vector.shape_cast %12 : vector<8x128xf32> to vector<1x8x128xf32>
      tpu.vector_store %arg6[%c1, %c0_17, %c0_18], %19 {strides = array<i32>} : memref<2x8x128xf32, #tpu.memory_space<vmem>>, vector<1x8x128xf32>,
    } else {
    }
    return
  }
  func.func @transform_0(%arg0: i32, %arg1: i32, %arg2: i32) -> (i32, i32) {
    %c0_i32 = arith.constant 0 : i32
    return %arg0, %arg2 : i32, i32
  }
  func.func @transform_1(%arg0: i32, %arg1: i32, %arg2: i32) -> (i32, i32) {
    %c0_i32 = arith.constant 0 : i32
    return %arg1, %arg2 : i32, i32
  }
  func.func @transform_2(%arg0: i32, %arg1: i32, %arg2: i32) -> (i32, i32) {
    %c0_i32 = arith.constant 0 : i32
    return %arg0, %arg1 : i32, i32
  }
  func.func @transform_3(%arg0: i32, %arg1: i32, %arg2: i32) -> (i32, i32, i32) {
    %c0_i32 = arith.constant 0 : i32
    %c0_i32_0 = arith.constant 0 : i32
    return %c0_i32, %arg0, %arg1 : i32, i32, i32
  }
}

</mosaic_0001>

<bundles_post_ra>
// kernel: tpu_custom_call.1
= control target key start
LH: loop header
LB: loop body
LE: loop exit
PB: predicated region body
PF: predicated region fallthrough
CT: control target
= control target key end

     0   :  { %9 = vsyncpa [#allocation4], 0  ;;  %s454_s0 = inlined_call_operand.hbm [shape: f32[8,128], index: 0, kind: input, shape index: {}]   ;;  %s455_s1 = inlined_call_operand.hbm [shape: f32[128,128], index: 1, kind: input, shape index: {}]   ;;  %s456_s2 = inlined_call_operand.hbm [shape: f32[8,128], index: 2, kind: output, shape index: {0}]   ;;  %s457_s3 = inlined_call_operand.hbm [shape: f32[2,8,128], index: 3, kind: output, shape index: {1}]  }
   0x1   :  { %10 = vsyncpa [#allocation7], 0 }
   0x2   :  { %11 = vsyncpa [#allocation5], 0 }
   0x3   :  { %12 = vsyncpa [#allocation10], 0  ;;  %s357_s12 = smov [#allocation3]   ;;  %s358_s14 = smov [#allocation6]  }
   0x4   :  { %s19_s13 = sshll.u32 %s357_s12, 4  ;;  %s28_s15 = sshll.u32 %s358_s14, 4  ;;  %s20_s13 = int_to_ptr.vmem [resolvable:$true] %s19_s13  ;;  %s386_s15 = int_to_ptr.vmem [resolvable:$true] %s28_s15 }
   0x5   :  { %s261_s18 = scalar_lea.hbm %s454_s0, 128 }
   0x6   :  { %p262_p0 = scmp.ne.s32.totalorder %s454_s0, %s261_s18  ;;  %p265_p1 = scmp.lt.u32.totalorder %s261_s18, %s454_s0 }
   0x8   :  { %p267_p2 = pnand %p265_p1, %p262_p0 }
   0xa   :  { %270 = shalt.err (!%p267_p2)
}
   0xb   :  { %s271_s23 = scalar_lea.vmem %s20_s13, 128  ;;  %p276_p4 = scmp.lt.s32.totalorder %s20_s13, %s20_s13 }
   0xc   :  { %p272_p3 = scmp.ne.s32.totalorder %s20_s13, %s271_s23  ;;  %p277_p5 = scmp.lt.s32.totalorder %s271_s23, %s271_s23 }
   0xe   :  { %p278_p6 = por %p277_p5, %p276_p4 }
  0x10   :  { %p279_p7 = pnand %p278_p6, %p272_p3 }
  0x12   :  { %282 = shalt.err (!%p279_p7)
}
  0x13   :  { %22 = dma.hbm_to_vmem [thread:$0]  %s454_s0, 128, %s20_s13, [#allocation4]  }
  0x14   :  { %s283_s28 = scalar_lea.hbm %s455_s1, 2048 }
  0x15   :  { %p284_p8 = scmp.ne.s32.totalorder %s455_s1, %s283_s28  ;;  %p287_p9 = scmp.lt.u32.totalorder %s283_s28, %s455_s1 }
  0x17   :  { %p289_p10 = pnand %p287_p9, %p284_p8 }
  0x19   :  { %292 = shalt.err (!%p289_p10)
}
  0x1a   :  { %s293_s6 = scalar_lea.vmem %s386_s15, 2048  ;;  %p298_p12 = scmp.lt.s32.totalorder %s386_s15, %s386_s15 }
  0x1b   :  { %p294_p11 = scmp.ne.s32.totalorder %s386_s15, %s293_s6  ;;  %p299_p13 = scmp.lt.s32.totalorder %s293_s6, %s293_s6 }
  0x1d   :  { %p300_p0 = por %p299_p13, %p298_p12 }
  0x1f   :  { %p301_p1 = pnand %p300_p0, %p294_p11 }
  0x21   :  { %304 = shalt.err (!%p301_p1)
}
  0x22   :  { %s359_s0 = smov 128   ;;  %s360_s7 = smov 8  }
  0x23   :  { %34 = dma.hbm_to_vmem [thread:$0]  %s455_s1, 2048, %s386_s15, [#allocation7], %s359_s0, %s359_s0, %s360_s7  }
  0x24   :  { %349 = dma.done.wait [#allocation4], 128  }
  0x25   :  { %350 = vsyncadd [#allocation4], 4294967168 }
  0x26   :  { %351 = dma.done.wait [#allocation7], 2048  }
  0x27   :  { %352 = vsyncadd [#allocation7], 4294965248  ;;  %v361_v0 = vmov 0.0|0.0   ;;  %vm362_vm0 = vmmov 0   ;;  %v363_v1 = vmov 0.0   ;;  %v48_v2 = vld [vmem:[#allocation6] sm:$0xff] }
  0x28   :  { %228 = vmatprep.subr.bf16.mxu0 %v361_v0  ;;  %225 = vmatprep.mubr.msk.f32.mxu0 %vm362_vm0, %v363_v1  ;;  %v49_v3 = vld [vmem:[#allocation6 + $0x8] sm:$0xff]  ;;  %v50_v5 = vld [vmem:[#allocation6 + $0x10] sm:$0xff]  ;;  %v51_v6 = vld [vmem:[#allocation6 + $0x18] sm:$0xff]  ;;  %s364_s1 = smov [#allocation8]   ;;  %s365_s11 = smov [#allocation9]  }
  0x29   :  { %v229_v4 = vpack.c.bf16 %v49_v3, %v48_v2  ;;  %v232_v7 = vpack.c.bf16 %v51_v6, %v50_v5  ;;  %v52_v8 = vld [vmem:[#allocation6 + $0x20] sm:$0xff]  ;;  %v53_v9 = vld [vmem:[#allocation6 + $0x28] sm:$0xff]  ;;  %v54_v11 = vld [vmem:[#allocation6 + $0x30] sm:$0xff]  ;;  %s150_s10 = sshll.u32 %s364_s1, 4  ;;  %s159_s12 = sshll.u32 %s365_s11, 4  ;;  %s151_s10 = int_to_ptr.vmem [resolvable:$true] %s150_s10  ;;  %s420_s12 = int_to_ptr.vmem [resolvable:$true] %s159_s12 }
  0x2a   :  { %v235_v10 = vpack.c.bf16 %v53_v9, %v52_v8  ;;  %v55_v12 = vld [vmem:[#allocation6 + $0x38] sm:$0xff]  ;;  %v56_v14 = vld [vmem:[#allocation6 + $0x40] sm:$0xff]  ;;  %v57_v15 = vld [vmem:[#allocation6 + $0x48] sm:$0xff]  ;;  %s305_s13 = scalar_lea.vmem %s151_s10, 128  ;;  %p310_p3 = scmp.lt.s32.totalorder %s151_s10, %s151_s10 }
  0x2b   :  { %230 = vmatpush3.bf16.xpose.msra.mxu0 %v229_v4  ;;  %v238_v13 = vpack.c.bf16 %v55_v12, %v54_v11  ;;  %v241_v16 = vpack.c.bf16 %v57_v15, %v56_v14  ;;  %v58_v17 = vld [vmem:[#allocation6 + $0x50] sm:$0xff]  ;;  %v59_v18 = vld [vmem:[#allocation6 + $0x58] sm:$0xff]  ;;  %v60_v20 = vld [vmem:[#allocation6 + $0x60] sm:$0xff]  ;;  %p306_p2 = scmp.ne.s32.totalorder %s151_s10, %s305_s13  ;;  %p311_p4 = scmp.lt.s32.totalorder %s305_s13, %s305_s13 }
  0x2c   :  { %231 = vmatprep.subr.bf16.mxu0 %v361_v0  ;;  %v244_v19 = vpack.c.bf16 %v59_v18, %v58_v17  ;;  %v61_v21 = vld [vmem:[#allocation6 + $0x68] sm:$0xff]  ;;  %v62_v23 = vld [vmem:[#allocation6 + $0x70] sm:$0xff]  ;;  %v63_v24 = vld [vmem:[#allocation6 + $0x78] sm:$0xff] }
  0x2d   :  { %v247_v22 = vpack.c.bf16 %v61_v21, %v60_v20  ;;  %v250_v25 = vpack.c.bf16 %v63_v24, %v62_v23  ;;  %v47_v26 = vld [vmem:[#allocation3] sm:$0xff]  ;;  %p312_p5 = por %p311_p4, %p310_p3 }
  0x2f   :  { %p313_p6 = pnand %p312_p5, %p306_p2 }
  0x33   :  { %233 = vmatpush3.bf16.xpose.msra.mxu0 %v232_v7 }
  0x34   :  { %234 = vmatprep.subr.bf16.mxu0 %v361_v0 }
  0x3b   :  { %236 = vmatpush3.bf16.xpose.msra.mxu0 %v235_v10 }
  0x3c   :  { %237 = vmatprep.subr.bf16.mxu0 %v361_v0 }
  0x43   :  { %239 = vmatpush3.bf16.xpose.msra.mxu0 %v238_v13 }
  0x44   :  { %240 = vmatprep.subr.bf16.mxu0 %v361_v0 }
  0x4b   :  { %242 = vmatpush3.bf16.xpose.msra.mxu0 %v241_v16 }
  0x4c   :  { %243 = vmatprep.subr.bf16.mxu0 %v361_v0 }
  0x53   :  { %245 = vmatpush3.bf16.xpose.msra.mxu0 %v244_v19 }
  0x54   :  { %246 = vmatprep.subr.bf16.mxu0 %v361_v0 }
  0x5b   :  { %248 = vmatpush3.bf16.xpose.msra.mxu0 %v247_v22 }
  0x5c   :  { %249 = vmatprep.subr.bf16.mxu0 %v361_v0 }
  0x63   :  { %251 = vmatpush3.bf16.xpose.msra.mxu0 %v250_v25 }
  0x6a   :  { %226 = vmatmul.mubr.f32.vlgmr.msra.gmra.mrb[0].mxu0 %v47_v26 }
 0x13d   :  { %v130_v27 = vpop.f32.mrb[0].mxu0 }
 0x13e   :  { %140 = vst [vmem:[#allocation8] sm:$0xff] %v130_v27  ;;  %141 = vst [vmem:[#allocation9] sm:$0xff] %v130_v27  ;;  %v227_v28 = vpop.f32.mrb[1].mxu0 }
 0x13f   :  { %143 = vst [vmem:[#allocation9 + $0x8] sm:$0xff] %v130_v27 }
 0x140   :  { %316 = shalt.err (!%p313_p6)
}
 0x141   :  { %s317_s16 = scalar_lea.hbm %s456_s2, 128 }
 0x142   :  { %p318_p7 = scmp.ne.s32.totalorder %s456_s2, %s317_s16  ;;  %p321_p8 = scmp.lt.u32.totalorder %s317_s16, %s456_s2 }
 0x144   :  { %p323_p9 = pnand %p321_p8, %p318_p7 }
 0x146   :  { %326 = shalt.err (!%p323_p9)
}
 0x147   :  { %153 = dma.vmem_to_hbm [thread:$0]  %s151_s10, 128, %s456_s2, [#allocation5]  }
 0x148   :  { %s327_s23 = scalar_lea.vmem %s420_s12, 256  ;;  %p332_p11 = scmp.lt.s32.totalorder %s420_s12, %s420_s12 }
 0x149   :  { %p328_p10 = scmp.ne.s32.totalorder %s420_s12, %s327_s23  ;;  %p333_p12 = scmp.lt.s32.totalorder %s327_s23, %s327_s23 }
 0x14b   :  { %p334_p13 = por %p333_p12, %p332_p11 }
 0x14d   :  { %p335_p0 = pnand %p334_p13, %p328_p10 }
 0x14f   :  { %338 = shalt.err (!%p335_p0)
}
 0x150   :  { %s339_s26 = scalar_lea.hbm %s457_s3, 256 }
 0x151   :  { %p340_p1 = scmp.ne.s32.totalorder %s457_s3, %s339_s26  ;;  %p343_p2 = scmp.lt.u32.totalorder %s339_s26, %s457_s3 }
 0x153   :  { %p345_p3 = pnand %p343_p2, %p340_p1 }
 0x155   :  { %348 = shalt.err (!%p345_p3)
}
 0x156   :  { %165 = dma.vmem_to_hbm [thread:$0]  %s420_s12, 256, %s457_s3, [#allocation10], %s359_s0, %s359_s0, %s360_s7  }
 0x157   :  { %353 = dma.done.wait [#allocation5], 128  }
 0x158   :  { %354 = vsyncadd [#allocation5], 4294967168 }
 0x159   :  { %355 = dma.done.wait [#allocation10], 256  }
 0x15a   :  { %356 = vsyncadd [#allocation10], 4294967040 }
 0x15b   :  { %172 = vsyncpa [#allocation4], 1 }
 0x15c   :  { %173 = vsyncpa [#allocation7], 1 }
 0x15d   :  { %174 = vsyncpa [#allocation5], 1 }
 0x15e   :  { %175 = vsyncpa [#allocation10], 1 }

</bundles_post_ra>
